<compile_context>
chip_gen: v6e
topology: v6e:2x2x1
jax: 0.10.0
libtpu: 0.0.40
codegen_flags: <defaults>
</compile_context>

<pallas_src>
import math

import jax
import jax.numpy as jnp
from jax import lax
from jax.experimental import pallas as pl
from jax.experimental.pallas import tpu as pltpu


def _round_up(x, m):
    return ((x + m - 1) // m) * m


# ----------------------------------------------------------------------------
# Pallas kernels
# ----------------------------------------------------------------------------
def _matmul_bias_resident_kernel(col_ref, w_ref, b_ref, out_ref):
    """out = col @ W + bias; whole weight panel resident in VMEM (grid over M only)."""
    out_ref[...] = (
        jnp.dot(col_ref[...], w_ref[...], preferred_element_type=jnp.float32)
        + b_ref[...])


def _matmul_bias_acc_kernel(col_ref, w_ref, b_ref, out_ref):
    """Fallback: K-tiled reduction accumulating directly into the f32 output block."""
    k = pl.program_id(2)

    @pl.when(k == 0)
    def _():
        out_ref[...] = jnp.broadcast_to(b_ref[...], out_ref.shape)

    out_ref[...] += jnp.dot(col_ref[...], w_ref[...],
                            preferred_element_type=jnp.float32)


# ----------------------------------------------------------------------------
# Matmul + bias wrapper
# ----------------------------------------------------------------------------
def _matmul_resident(col, w, b2, M, d_pad, cout_pad, tm):
    w_bytes = d_pad * cout_pad * 2
    # per-M-row VMEM: col double-buffer (bf16) + out double-buffer (f32)
    per_row = 2 * d_pad * 2 + 2 * cout_pad * 4
    budget = 28 * (1 << 20) - w_bytes

    tm_eff = min(tm, M)
    if tm_eff < M:
        tm_eff = max(8, (tm_eff // 8) * 8)
    while tm_eff > 8 and tm_eff * per_row > budget:
        tm_eff = max(8, ((tm_eff // 2) // 8) * 8)

    # v7x has 2 TensorCores: keep >= 2 parallel M blocks when M is big enough.
    if tm_eff >= M and M >= 512:
        tm_eff = _round_up((M + 1) // 2, 8)

    grid_m = pl.cdiv(M, tm_eff)

    vmem_need = 2 * w_bytes + tm_eff * per_row + 2 * cout_pad * 4
    vmem_limit = int(min(max(2 * vmem_need, 16 * (1 << 20)), 48 * (1 << 20)))

    return pl.pallas_call(
        _matmul_bias_resident_kernel,
        out_shape=jax.ShapeDtypeStruct((M, cout_pad), jnp.float32),
        grid_spec=pltpu.PrefetchScalarGridSpec(
            num_scalar_prefetch=0,
            grid=(grid_m,),
            in_specs=[
                pl.BlockSpec((tm_eff, d_pad), lambda i: (i, 0)),
                pl.BlockSpec((d_pad, cout_pad), lambda i: (0, 0)),  # resident weight
                pl.BlockSpec((1, cout_pad), lambda i: (0, 0)),      # resident bias
            ],
            out_specs=pl.BlockSpec((tm_eff, cout_pad), lambda i: (i, 0)),
        ),
        compiler_params=pltpu.CompilerParams(
            dimension_semantics=("parallel",),
            vmem_limit_bytes=vmem_limit,
        ),
    )(col, w, b2)


def _pick_tile(total, candidates):
    for t in candidates:
        if total % t == 0:
            return t
    return candidates[-1]


def _matmul_tiled(col, w, b2, M, d_pad, cout_pad):
    """Fallback for weight panels too large to keep VMEM-resident."""
    # MXU-native widths first (256x256 on v6e/v7x), 128 always divides the padded dims.
    tn = _pick_tile(cout_pad, (512, 256, 384, 128))
    tk = _pick_tile(d_pad, (512, 256, 384, 128))

    per_row = 2 * tk * 2 + 2 * tn * 4           # col dbuf + out dbuf per M-row
    fixed = 2 * tk * tn * 2 + 2 * tn * 4        # weight dbuf + bias dbuf
    budget = 28 * (1 << 20) - fixed

    tm_eff = min(2048, M)                        # large tm cuts weight re-streaming
    if tm_eff < M:
        tm_eff = max(8, (tm_eff // 8) * 8)
    while tm_eff > 8 and tm_eff * per_row > budget:
        tm_eff = max(8, ((tm_eff // 2) // 8) * 8)

    grid = (pl.cdiv(M, tm_eff), cout_pad // tn, d_pad // tk)
    vmem_need = fixed + tm_eff * per_row
    vmem_limit = int(min(max(2 * vmem_need, 16 * (1 << 20)), 48 * (1 << 20)))

    return pl.pallas_call(
        _matmul_bias_acc_kernel,
        out_shape=jax.ShapeDtypeStruct((M, cout_pad), jnp.float32),
        grid_spec=pltpu.PrefetchScalarGridSpec(
            num_scalar_prefetch=0,
            grid=grid,
            in_specs=[
                pl.BlockSpec((tm_eff, tk), lambda i, j, k: (i, k)),
                pl.BlockSpec((tk, tn), lambda i, j, k: (k, j)),
                pl.BlockSpec((1, tn), lambda i, j, k: (0, j)),
            ],
            out_specs=pl.BlockSpec((tm_eff, tn), lambda i, j, k: (i, j)),
        ),
        compiler_params=pltpu.CompilerParams(
            dimension_semantics=("parallel", "parallel", "arbitrary"),
            vmem_limit_bytes=vmem_limit,
        ),
    )(col, w, b2)


def matmul_bias(col, w, bias, *, tm=1024):
    """out[M, Cout] = col @ w + bias   (bf16 MXU operands, f32 accumulation).

    col: [M, D], w: [D, Cout], bias: [Cout].
    """
    M, D = col.shape
    Cout = w.shape[1]

    # Lane-dense output: pad Cout to a multiple of 128 (weight / bias pads are tiny).
    cout_pad = _round_up(Cout, 128)
    if cout_pad != Cout:
        w = jnp.pad(w, ((0, 0), (0, cout_pad - Cout)))
        bias = jnp.pad(bias, (0, cout_pad - Cout))

    # Lane-dense reduction axis: zero-pad D only when misaligned (exact on a reduction
    # axis; the pad fuses with the producing transpose/cast in the glue).
    d_pad = _round_up(D, 128)
    if d_pad != D:
        col = jnp.pad(col, ((0, 0), (0, d_pad - D)))
        w = jnp.pad(w, ((0, d_pad - D), (0, 0)))

    col = col.astype(jnp.bfloat16)
    w = w.astype(jnp.bfloat16)
    b2 = bias.reshape(1, cout_pad).astype(jnp.float32)

    w_bytes = d_pad * cout_pad * 2
    if w_bytes <= 12 * (1 << 20):
        out = _matmul_resident(col, w, b2, M, d_pad, cout_pad, tm)
    else:
        out = _matmul_tiled(col, w, b2, M, d_pad, cout_pad)

    return out[:, :Cout] if cout_pad != Cout else out


# ----------------------------------------------------------------------------
# JAX glue: deformable bilinear im2col with modulation folded in
# ----------------------------------------------------------------------------
def _deform_sample_modulated(x, off_y, off_x, mask, kh, kw, stride, padding,
                             dilation, out_dtype=jnp.bfloat16):
    """Bilinear deformable im2col for one deformable group, modulation mask folded in
    (f32 math, bf16 output columns).

    x: [N, Cg, H, W]; off_y, off_x, mask: [N, K, Ho, Wo] -> columns [N*Ho*Wo, Cg*K].
    """
    # TODO(synk): the data-dependent bilinear gather is done in JAX glue (arbitrary
    # gather has no clean in-kernel Pallas TPU equivalent at these shapes).
    N, C, H, W = x.shape
    K = kh * kw
    Ho, Wo = off_y.shape[2], off_y.shape[3]

    ki = (jnp.arange(K) // kw).astype(jnp.float32) * dilation
    kj = (jnp.arange(K) % kw).astype(jnp.float32) * dilation
    base_y = (jnp.arange(Ho) * stride - padding).astype(jnp.float32)
    base_x = (jnp.arange(Wo) * stride - padding).astype(jnp.float32)

    py = base_y[None, None, :, None] + ki[None, :, None, None] + off_y
    px = base_x[None, None, None, :] + kj[None, :, None, None] + off_x

    y0 = jnp.floor(py)
    x0 = jnp.floor(px)
    ly = py - y0
    lx = px - x0
    hy = 1.0 - ly
    hx = 1.0 - lx
    y0i = y0.astype(jnp.int32)
    x0i = x0.astype(jnp.int32)

    x_flat = x.reshape(N, C, H * W)

    def corner(yi, xi):
        valid = (yi >= 0) & (yi < H) & (xi >= 0) & (xi < W)
        yc = jnp.clip(yi, 0, H - 1)
        xc = jnp.clip(xi, 0, W - 1)
        lin = (yc * W + xc).reshape(N, 1, K * Ho * Wo)
        v = jnp.take_along_axis(x_flat, lin, axis=2)
        v = v.reshape(N, C, K, Ho, Wo)
        return v * valid.reshape(N, 1, K, Ho, Wo).astype(x.dtype)

    v00 = corner(y0i, x0i)
    v01 = corner(y0i, x0i + 1)
    v10 = corner(y0i + 1, x0i)
    v11 = corner(y0i + 1, x0i + 1)

    w00 = (hy * hx)[:, None]
    w01 = (hy * lx)[:, None]
    w10 = (ly * hx)[:, None]
    w11 = (ly * lx)[:, None]

    sampled = v00 * w00 + v01 * w01 + v10 * w10 + v11 * w11   # [N,C,K,Ho,Wo] f32
    sampled = sampled * mask[:, None]                          # modulation folded here
    col = sampled.transpose(0, 3, 4, 1, 2).reshape(N * Ho * Wo, C * K)
    return col.astype(out_dtype)


# ----------------------------------------------------------------------------
# Module equivalent
# ----------------------------------------------------------------------------
class ModulatedDeformConvPackPallas:
    def __init__(self, in_channels, out_channels, kernel_size, stride=1,
                 padding=0, dilation=1, groups=1, deformable_groups=1,
                 bias=True, *, key):
        assert groups == 1  # TODO(synk): grouped conv (groups>1) not implemented
        self.in_channels = in_channels
        self.out_channels = out_channels
        self.kernel_size = (kernel_size, kernel_size) if isinstance(
            kernel_size, int) else tuple(kernel_size)
        self.stride = stride
        self.padding = padding
        self.dilation = dilation
        self.groups = groups
        self.deformable_groups = deformable_groups
        self.with_bias = bias

        kh, kw = self.kernel_size
        n = in_channels * kh * kw
        stdv = 1.0 / math.sqrt(n)
        # main conv weight: uniform(-stdv, stdv); bias: zeros (init_weights)
        self.weight = jax.random.uniform(
            key, (out_channels, in_channels // groups, kh, kw),
            dtype=jnp.float32, minval=-stdv, maxval=stdv)
        self.bias = jnp.zeros((out_channels,), jnp.float32)

        # conv_offset: zero-initialized weight and bias (init_offset)
        off_ch = deformable_groups * 3 * kh * kw
        self.conv_offset_weight = jnp.zeros(
            (off_ch, in_channels, kh, kw), jnp.float32)
        self.conv_offset_bias = jnp.zeros((off_ch,), jnp.float32)

    def __call__(self, x):
        x = x.astype(jnp.float32)
        N, C, H, W = x.shape
        kh, kw = self.kernel_size
        K = kh * kw
        dg = self.deformable_groups
        s, p, d = self.stride, self.padding, self.dilation

        # ---- conv_offset: plain 2D conv (the spec's nn.Conv2d has no dilation arg),
        # done with XLA's native conv: no im2col round-trip, no 27->128 padded matmul.
        out_off = lax.conv_general_dilated(
            x, self.conv_offset_weight,
            window_strides=(s, s), padding=[(p, p), (p, p)],
            dimension_numbers=("NCHW", "OIHW", "NCHW"))
        out_off = out_off + self.conv_offset_bias[None, :, None, None]
        Ho, Wo = out_off.shape[2], out_off.shape[3]

        # conv_offset (dilation=1) must produce the same spatial grid as the dilated
        # main conv for the Pack module to be well-defined (always true for dilation=1).
        ho_main = (H + 2 * p - (d * (kh - 1) + 1)) // s + 1
        wo_main = (W + 2 * p - (d * (kw - 1) + 1)) // s + 1
        if (Ho, Wo) != (ho_main, wo_main):
            raise NotImplementedError(
                "conv_offset grid (dilation=1) mismatches dilated main-conv grid")

        # ---- split into offsets + mask, literally following the NPU forward:
        #   offset_ori = cat(o1, o2); offset_x = even channels, offset_y = odd channels.
        # TODO(synk): this even/odd -> x/y mapping mirrors the NPU code; it is swapped
        # vs mmcv's CUDA convention (even = h/y) -- validate vs a nonzero-offset ref.
        o1 = out_off[:, :dg * K]
        o2 = out_off[:, dg * K:2 * dg * K]
        mask_logits = out_off[:, 2 * dg * K:]
        offset_ori = jnp.concatenate([o1, o2], axis=1)        # [N, 2*dg*K, Ho, Wo]
        offset_x = offset_ori[:, ::2]
        offset_y = offset_ori[:, 1::2]
        mask = jax.nn.sigmoid(mask_logits)                    # [N, dg*K, Ho, Wo]

        # ---- deformable bilinear im2col with modulation folded in (bf16 columns)
        cg = C // dg
        cols = []
        for g in range(dg):
            cols.append(_deform_sample_modulated(
                x[:, g * cg:(g + 1) * cg],
                offset_y[:, g * K:(g + 1) * K],
                offset_x[:, g * K:(g + 1) * K],
                mask[:, g * K:(g + 1) * K],
                kh, kw, s, p, d))                              # [M, cg*K]
        col = cols[0] if dg == 1 else jnp.concatenate(cols, axis=1)   # [M, C*K]

        w_main = self.weight.reshape(self.out_channels, C * K).T
        out = matmul_bias(col, w_main, self.bias)              # [M, Cout] f32 (Pallas)
        # Module boundary is NCHW (PyTorch).  A NHWC consumer could skip this transpose
        # and consume out.reshape(N, Ho, Wo, Cout) directly (saves one HBM pass).
        out = out.reshape(N, Ho, Wo, self.out_channels).transpose(0, 3, 1, 2)
        return out


# ----------------------------------------------------------------------------
if __name__ == "__main__":
    key = jax.random.PRNGKey(0)
    kx, kw = jax.random.split(key)

    N, Cin, H, W = 2, 4, 16, 16
    Cout, ksz, stride, pad = 8, 3, 1, 1

    x = jax.random.normal(kx, (N, Cin, H, W), jnp.float32)

    mod = ModulatedDeformConvPackPallas(
        Cin, Cout, ksz, stride=stride, padding=pad, dilation=1,
        groups=1, deformable_groups=1, bias=True, key=kw)

    y = mod(x)
    y = jax.block_until_ready(y)

    # Sanity check: conv_offset is zero-initialized, so offsets == 0 and
    # mask == sigmoid(0) == 0.5  =>  output == 0.5 * conv2d(x, weight) + bias.
    ref = lax.conv_general_dilated(
        x, mod.weight, window_strides=(stride, stride),
        padding=[(pad, pad), (pad, pad)],
        dimension_numbers=("NCHW", "OIHW", "NCHW"))
    ref = 0.5 * ref + mod.bias[None, :, None, None]
    assert y.shape == (N, Cout, H, W), y.shape
    # bf16 matmul operands with f32 accumulation -> loose tolerance vs f32 reference.
    assert jnp.allclose(y, ref, atol=3e-2, rtol=3e-2), "mismatch vs reference"

    print("KERNEL_OK")
</pallas_src>

<mosaic_0001>
module attributes {stable_mosaic.version = 11 : i64} {
  func.func @_matmul_bias_resident_kernel(%arg0: i32, %arg1: memref<256x128xbf16, #tpu.memory_space<vmem>>, %arg2: memref<128x128xbf16, #tpu.memory_space<vmem>>, %arg3: memref<1x128xf32, #tpu.memory_space<vmem>>, %arg4: memref<256x128xf32, #tpu.memory_space<vmem>>) attributes {dimension_semantics = [#tpu.dimension_semantics<parallel>], iteration_bounds = array<i64: 2>, scalar_prefetch = 0 : i64, scratch_operands = 0 : i64, tpu.core_type = #tpu.core_type<tc>, window_params = [{transform_indices = @transform_0, window_bounds = array<i64: 256, 128>}, {pipeline_mode = #tpu.pipeline_mode<synchronous>, transform_indices = @transform_1, window_bounds = array<i64: 128, 128>}, {pipeline_mode = #tpu.pipeline_mode<synchronous>, transform_indices = @transform_2, window_bounds = array<i64: 1, 128>}, {transform_indices = @transform_3, window_bounds = array<i64: 256, 128>}]} {
    %c0 = arith.constant 0 : index
    %c0_0 = arith.constant 0 : index
    %0 = vector.load %arg1[%c0, %c0_0] : memref<256x128xbf16, #tpu.memory_space<vmem>>, vector<256x128xbf16>
    %c0_1 = arith.constant 0 : index
    %c0_2 = arith.constant 0 : index
    %1 = vector.load %arg2[%c0_1, %c0_2] : memref<128x128xbf16, #tpu.memory_space<vmem>>, vector<128x128xbf16>
    %cst = arith.constant dense<0.000000e+00> : vector<256x128xf32>
    %2 = tpu.matmul %0, %1, %cst {dimension_numbers = #tpu.dot_dimension_numbers<[1], [0], [0], [1], [0, 0, 1, 1], [], []>} : vector<256x128xbf16>, vector<128x128xbf16>, vector<256x128xf32> -> vector<256x128xf32>
    %c0_3 = arith.constant 0 : index
    %c0_4 = arith.constant 0 : index
    %3 = vector.load %arg3[%c0_3, %c0_4] : memref<1x128xf32, #tpu.memory_space<vmem>>, vector<1x128xf32>
    %4 = vector.broadcast %3 : vector<1x128xf32> to vector<256x128xf32>
    %5 = arith.addf %2, %4 : vector<256x128xf32>
    %c0_5 = arith.constant 0 : index
    %c0_6 = arith.constant 0 : index
    %6 = vector.load %arg4[%c0_5, %c0_6] : memref<256x128xf32, #tpu.memory_space<vmem>>, vector<256x128xf32>
    tpu.vector_store %arg4[%c0_5, %c0_6], %5 {strides = array<i32>} : memref<256x128xf32, #tpu.memory_space<vmem>>, vector<256x128xf32>,
    return
  }
  func.func @transform_0(%arg0: i32) -> (i32, i32) {
    %c0_i32 = arith.constant 0 : i32
    %c0_i32_0 = arith.constant 0 : i32
    return %arg0, %c0_i32 : i32, i32
  }
  func.func @transform_1(%arg0: i32) -> (i32, i32) {
    %c0_i32 = arith.constant 0 : i32
    %c0_i32_0 = arith.constant 0 : i32
    %c0_i32_1 = arith.constant 0 : i32
    return %c0_i32, %c0_i32_0 : i32, i32
  }
  func.func @transform_2(%arg0: i32) -> (i32, i32) {
    %c0_i32 = arith.constant 0 : i32
    %c0_i32_0 = arith.constant 0 : i32
    %c0_i32_1 = arith.constant 0 : i32
    return %c0_i32, %c0_i32_0 : i32, i32
  }
  func.func @transform_3(%arg0: i32) -> (i32, i32) {
    %c0_i32 = arith.constant 0 : i32
    %c0_i32_0 = arith.constant 0 : i32
    return %arg0, %c0_i32 : i32, i32
  }
}

</mosaic_0001>

<bundles_post_ra>
// kernel: tpu_custom_call.1
= control target key start
LH: loop header
LB: loop body
LE: loop exit
PB: predicated region body
PF: predicated region fallthrough
CT: control target
= control target key end

     0   :  { %8 = vsyncpa [#allocation3], 0  ;;  %s1337_s0 = inlined_call_operand.hbm [shape: bf16[512,128], index: 0, kind: input, shape index: {}]   ;;  %s1338_s1 = inlined_call_operand.hbm [shape: bf16[128,128], index: 1, kind: input, shape index: {}]   ;;  %s1339_s2 = inlined_call_operand.vmem [shape: f32[1,128], index: 2, kind: input, shape index: {}]   ;;  %s1340_s3 = inlined_call_operand.hbm [shape: f32[512,128], index: 3, kind: output, shape index: {}]  }
   0x1   :  { %10 = vsyncpa [#allocation3 + $0x1], 0 }
   0x2   :  { %11 = vsyncpa [#allocation6], 0 }
   0x3   :  { %12 = vsyncpa [#allocation4], 0 }
   0x4   :  { %14 = vsyncpa [#allocation4 + $0x1], 0  ;;  %s1063_s12 = smov 0   ;;  %s1065_s13 = smov 0  }
   0x5   :  { %s1067_s14 = smov 0   ;;  %s1069_s15 = smov 0  }
   0x6 LB: > { %s1084_s16 = sadd.s32 4294967295, %s1034_s15   ;;  %s696_s17 = sadd.s32 4294967294, %s1034_s15   ;;  %s1034_s15 = sphi %s1069_s15, %s1362_s15   ;;  %s1030_s14 = sphi %s1067_s14, %s1361_s14   ;;  %s1026_s13 = sphi %s1065_s13, %s1360_s13   ;;  %s1022_s12 = sphi %s1063_s12, %s1359_s12  }
   0x7   : > { %p40_p0 = scmp.ne.s32.totalorder %s1026_s13, %s1022_s12  ;;  %p1341_p1 = scmp.eq.s32.totalorder %s1084_s16, 0 }
   0x8   : > { %p112_p3 = scmp.eq.s32.totalorder %s696_s17, 1  ;;  %p697_p5 = scmp.ge.s32.totalorder %s1034_s15, 1 }
   0x9   : > { %p1093_p4 = por %p1341_p1, %p40_p0  ;;  %p119_p7 = scmp.lt.s32.totalorder %s1034_s15, 3 }
   0xa   : > { %p1098_p6 = por %p112_p3, %p40_p0  ;;  %s1036_s21 = smov [#allocation5]  }
   0xb   : > { %s1345_s18 = scalar_select %p1093_p4, 1, 0 }
   0xc   : > { %s1346_s19 = scalar_select %p1098_p6, 1, 0 }
   0xd   : > { %p1103_p8 = pnand %p697_p5, %p119_p7  ;;  %s131_s22 = sshll.u32 %s1036_s21, 4  ;;  %s132_s22 = int_to_ptr.vmem [resolvable:$true] %s131_s22 }
   0xe   : > { %s1117_s24 = sadd.s32 1, %s1034_s15   ;;  %s27_s25 = sadd.s32 1, %s1030_s14 }
   0xf   : > { %s1347_s20 = scalar_select %p1103_p8, 1, 0 }
  0x10   : > { %p835_p9 = pneg %p1103_p8  ;;  %s24_s26 = ssub.s32 %s1034_s15, %s1117_s24 }
  0x11   : > { %s923_s27 = scalar_lea.vmem %s132_s22, 1024  ;;  %p931_p5 = scmp.lt.s32.totalorder %s132_s22, %s132_s22 }
  0x12   : > { %p1112_p11 = pnand %p835_p9, %p1341_p1  ;;  %p924_p13 = scmp.ne.s32.totalorder %s132_s22, %s923_s27 }
  0x13   : > { %p932_p7 = scmp.lt.s32.totalorder %s923_s27, %s923_s27 }
  0x14   : > { %p914_p12 = pneg %p1112_p11 }
  0x15   : > { %p933_p10 = por %p932_p7, %p931_p5 }
  0x16   : > { %p926_p0 = pnand %p924_p13, %p914_p12 }
  0x18   : > { %p927_p3 = pneg %p926_p0 }
  0x1a   : > { %p934_p2 = pnand %p933_p10, %p927_p3 }
  0x1c   : > { %937 = shalt.err (!%p934_p2)
}
  0x1d   : > { %s1037_s28 = smov 64   ;;  %s1038_s29 = smov 4  }
  0x1e   : > { %838 = dma.hbm_to_vmem [thread:$0]  (!%p1112_p11), %s1338_s1, 1024, %s132_s22, [#allocation6], %s1037_s28, %s1037_s28, %s1038_s29  }
  0x1f   : > { %p25_p2 = scmp.eq.s32.totalorder %s24_s26, 0  ;;  %p34_p9 = scmp.ne.s32.totalorder %s1030_s14, %s1026_s13 }
  0x20   : > { %p35_p10 = scmp.eq.s32.totalorder %s1034_s15, 0  ;;  %p848_p12 = scmp.lt.s32.totalorder %s1034_s15, 2 }
  0x21   : > { %s1137_s5 = scalar_select %p25_p2, %s1030_s14, %s27_s25  }
  0x22   : > { %p36_p13 = por %p35_p10, %p34_p9  ;;  %p1349_p0 = scmp.eq.s32.totalorder %s1084_s16, 1 }
  0x23   : > { %s148_s7 = sand.u32 1, %s1030_s14   ;;  %s737_s8 = sshll.u32 %s1034_s15, 11 }
  0x24   : > { %p1141_p3 = por %p1349_p0, %p34_p9  ;;  %s700_s9 = sshll.u32 %s148_s7, 7 }
  0x25   : > { %s1150_s17 = scalar_lea.hbm %s1337_s0, %s737_s8  ;;  %s152_s21 = scalar_lea.vmem [#allocation2], %s700_s9 }
  0x26   : > { %s1350_s6 = scalar_select %p1141_p3, 1, 0 }
  0x27   : > { %s159_s22 = sshll.u32 %s152_s21, 4  ;;  %p1152_p11 = pnand %p848_p12, %p36_p13  ;;  %s1156_s22 = int_to_ptr.vmem [resolvable:$true] %s159_s22 }
  0x28   : > { %s1158_s25 = scalar_lea.sflag [#allocation3], %s148_s7  ;;  %s938_s26 = scalar_lea.hbm %s1150_s17, 2048 }
  0x29   : > { %p939_p5 = scmp.ne.s32.totalorder %s1150_s17, %s938_s26  ;;  %p940_p7 = pneg %p1152_p11 }
  0x2a   : > { %s943_s4 = scalar_lea.hbm %s1337_s0, 4096  ;;  %p944_p10 = scmp.lt.s32.totalorder %s1150_s17, %s1337_s0 }
  0x2b   : > { %p941_p2 = pnand %p940_p7, %p939_p5  ;;  %p945_p12 = scmp.lt.s32.totalorder %s943_s4, %s938_s26 }
  0x2d   : > { %p942_p9 = pneg %p941_p2  ;;  %p946_p13 = por %p945_p12, %p944_p10 }
  0x2f   : > { %p947_p0 = pnand %p946_p13, %p942_p9 }
  0x31   : > { %950 = shalt.err (!%p947_p0)
}
  0x32   : > { %s951_s7 = scalar_lea.vmem %s1156_s22, 2048  ;;  %s1039_s10 = smov [#allocation2]  }
  0x33   : > { %p952_p1 = scmp.ne.s32.totalorder %s1156_s22, %s951_s7  ;;  %s956_s11 = sshll.u32 %s1039_s10, 4  ;;  %s957_s11 = int_to_ptr.vmem [resolvable:$false] %s956_s11 }
  0x34   : > { %s958_s21 = scalar_lea.vmem %s957_s11, 4096  ;;  %p959_p2 = scmp.lt.s32.totalorder %s1156_s22, %s957_s11 }
  0x35   : > { %p954_p6 = pnand %p952_p1, %p940_p7  ;;  %p960_p3 = scmp.lt.s32.totalorder %s958_s21, %s951_s7 }
  0x37   : > { %p955_p5 = pneg %p954_p6  ;;  %p961_p4 = por %p960_p3, %p959_p2 }
  0x39   : > { %p962_p8 = pnand %p961_p4, %p955_p5 }
  0x3b   : > { %965 = shalt.err (!%p962_p8)
}
  0x3c   : > { %842 = dma.hbm_to_vmem [thread:$0]  (!%p1152_p11), %s1150_s17, 2048, %s1156_s22, %s1158_s25, %s1037_s28, %s1037_s28, %s1038_s29  }
  0x3d   : > { %p1352_p1 = scmp.ne.s32.totalorder %s1347_s20, 0 }
  0x3e   : > { %s1185_s26 = sand.u32 (!%p1352_p1), 1, %s1026_s13   ;;  %p1353_p4 = scmp.ne.s32.totalorder (!%p1352_p1), %s1345_s18, 0 }
  0x3f   : > { %171 = sbr.rel (%p1352_p1) target bundleno = 344 (0x158), region = 32  ;;  %s704_s27 = sshll.u32 (!%p1352_p1), %s1185_s26, 7 }
  0x40   : > { %s174_s30 = scalar_lea.sflag (!%p1352_p1), [#allocation3], %s1185_s26  ;;  %s1189_s4 = scalar_lea.vmem (!%p1352_p1), [#allocation2], %s704_s27 }
  0x44   : > { %1009 = dma.done.wait (%p1353_p4), %s174_s30, 2048  }
  0x45   : > { %1011 = vsyncadd (%p1353_p4), %s174_s30, 4294965248  ;;  %p1354_p6 = scmp.eq.s32.totalorder %s1084_s16, 0 }
  0x47   : > { %1013 = dma.done.wait (%p1354_p6), [#allocation6], 1024   ;;  %p1355_p8 = pmov %p1354_p6 }
  0x48   : > { %v888_v0 = vld [vmem:[#allocation5 + $0x38] sm:$0xff]   ;;  %v889_v1 = vld [vmem:[#allocation5 + $0x30] sm:$0xff]   ;;  %v890_v2 = vld [vmem:[#allocation5 + $0x28] sm:$0xff]   ;;  %s706_s18 = sshll.u32 %s1185_s26, 8  ;;  %s738_s17 = sshll.u32 %s1084_s16, 12 }
  0x49   : > { %1015 = vsyncadd (%p1355_p8), [#allocation6], 4294966272  ;;  %763 = vmatprep.subr.bf16.mxu0 %v888_v0  ;;  %811 = vmatprep.subr.bf16.mxu1 %v888_v0  ;;  %v891_v3 = vld [vmem:[#allocation5 + $0x20] sm:$0xff]   ;;  %v892_v6 = vld [vmem:[#allocation5 + $0x18] sm:$0xff]   ;;  %s1223_s29 = scalar_lea.vmem [#allocation7], %s706_s18  ;;  %s1286_s8 = scalar_lea.hbm %s1340_s3, %s738_s17 }
  0x4a   : > { %764 = vmatpush3.bf16.msra.mxu0 %v888_v0  ;;  %819 = vmatpush3.bf16.msra.mxu1 %v888_v0  ;;  %v896_v4 = vld [vmem:[%s1189_s4] sm:$0xff]   ;;  %v893_v7 = vld [vmem:[#allocation5 + $0x10] sm:$0xff]   ;;  %v894_v8 = vld [vmem:[#allocation5 + $0x8] sm:$0xff]   ;;  %s613_s22 = sshll.u32 %s1223_s29, 4  ;;  %s600_s16 = scalar_lea.sflag [#allocation4], %s1185_s26  ;;  %s1288_s22 = int_to_ptr.vmem [resolvable:$true] %s613_s22 }
  0x4b   : > { %765 = vmatprep.subr.bf16.mxu0 %v889_v1  ;;  %812 = vmatprep.subr.bf16.mxu1 %v889_v1  ;;  %v897_v5 = vld [vmem:[%s1189_s4 + $0x40] sm:$0xff]   ;;  %v898_v10 = vld [vmem:[%s1189_s4 + $0x8] sm:$0xff]   ;;  %v900_v12 = vld [vmem:[%s1189_s4 + $0x10] sm:$0xff]   ;;  %s966_s9 = scalar_lea.vmem %s1288_s22, 4096  ;;  %p1356_p11 = scmp.ne.s32.totalorder %s1350_s6, 0 }
  0x4c   : > { %779 = vmatprep.mubr.bf16.mxu0 %v896_v4  ;;  %795 = vmatprep.mubr.bf16.mxu1 %v897_v5  ;;  %v895_v9 = vld [vmem:[#allocation5] sm:$0xff]   ;;  %v899_v11 = vld [vmem:[%s1189_s4 + $0x48] sm:$0xff]   ;;  %v901_v13 = vld [vmem:[%s1189_s4 + $0x50] sm:$0xff]   ;;  %p967_p3 = scmp.ne.s32.totalorder %s1288_s22, %s966_s9  ;;  %s1040_s7 = smov [#allocation7]  }
  0x4d   : > { %v902_v14 = vld [vmem:[%s1189_s4 + $0x18] sm:$0xff]   ;;  %v904_v16 = vld [vmem:[%s1189_s4 + $0x20] sm:$0xff]   ;;  %v906_v18 = vld [vmem:[%s1189_s4 + $0x28] sm:$0xff]   ;;  %s970_s10 = sshll.u32 %s1040_s7, 4  ;;  %s971_s10 = int_to_ptr.vmem [resolvable:$false] %s970_s10 }
  0x4e   : > { %766 = vmatpush3.bf16.msra.mxu0 %v889_v1  ;;  %820 = vmatpush3.bf16.msra.mxu1 %v889_v1  ;;  %v903_v15 = vld [vmem:[%s1189_s4 + $0x58] sm:$0xff]   ;;  %v905_v17 = vld [vmem:[%s1189_s4 + $0x60] sm:$0xff]   ;;  %v907_v19 = vld [vmem:[%s1189_s4 + $0x68] sm:$0xff]   ;;  %p968_p7 = pnand %p967_p3, %p1356_p11  ;;  %s972_s11 = scalar_lea.vmem %s971_s10, 8192 }
  0x4f   : > { %767 = vmatprep.subr.bf16.mxu0 %v890_v2  ;;  %813 = vmatprep.subr.bf16.mxu1 %v890_v2  ;;  %v908_v20 = vld [vmem:[%s1189_s4 + $0x30] sm:$0xff]   ;;  %v910_v22 = vld [vmem:[%s1189_s4 + $0x38] sm:$0xff]   ;;  %v1219_v24 = vld [vmem:[%s1339_s2] ss:$0 sm:$0xff]  ;;  %p973_p10 = scmp.lt.s32.totalorder %s1288_s22, %s971_s10  ;;  %p974_p12 = scmp.lt.s32.totalorder %s972_s11, %s966_s9 }
  0x50   : > { %v909_v21 = vld [vmem:[%s1189_s4 + $0x70] sm:$0xff]   ;;  %v911_v23 = vld [vmem:[%s1189_s4 + $0x78] sm:$0xff]   ;;  %p969_p9 = pneg %p968_p7 }
  0x51   : > { %p975_p13 = por %p974_p12, %p973_p10 }
  0x52   : > { %768 = vmatpush3.bf16.msra.mxu0 %v890_v2  ;;  %821 = vmatpush3.bf16.msra.mxu1 %v890_v2 }
  0x53   : > { %769 = vmatprep.subr.bf16.mxu0 %v891_v3  ;;  %814 = vmatprep.subr.bf16.mxu1 %v891_v3  ;;  %p976_p0 = pnand %p975_p13, %p969_p9 }
  0x56   : > { %770 = vmatpush3.bf16.msra.mxu0 %v891_v3  ;;  %822 = vmatpush3.bf16.msra.mxu1 %v891_v3 }
  0x57   : > { %771 = vmatprep.subr.bf16.mxu0 %v892_v6  ;;  %815 = vmatprep.subr.bf16.mxu1 %v892_v6 }
  0x5a   : > { %772 = vmatpush3.bf16.msra.mxu0 %v892_v6  ;;  %823 = vmatpush3.bf16.msra.mxu1 %v892_v6 }
  0x5b   : > { %773 = vmatprep.subr.bf16.mxu0 %v893_v7  ;;  %816 = vmatprep.subr.bf16.mxu1 %v893_v7 }
  0x5e   : > { %774 = vmatpush3.bf16.msra.mxu0 %v893_v7  ;;  %824 = vmatpush3.bf16.msra.mxu1 %v893_v7 }
  0x5f   : > { %775 = vmatprep.subr.bf16.mxu0 %v894_v8  ;;  %817 = vmatprep.subr.bf16.mxu1 %v894_v8 }
  0x62   : > { %776 = vmatpush3.bf16.msra.mxu0 %v894_v8  ;;  %825 = vmatpush3.bf16.msra.mxu1 %v894_v8 }
  0x63   : > { %777 = vmatprep.subr.bf16.mxu0 %v895_v9  ;;  %818 = vmatprep.subr.bf16.mxu1 %v895_v9 }
  0x66   : > { %778 = vmatpush3.bf16.msra.mxu0 %v895_v9  ;;  %826 = vmatpush3.bf16.msra.mxu1 %v895_v9 }
  0x69   : > { %780 = vmatmul.mubr.bf16.vlgmr.msra.gmra.mxu0 %v898_v10  ;;  %796 = vmatmul.mubr.bf16.vlgmr.msra.gmra.mxu1 %v899_v11 }
  0x6a   : > { %783 = vmatprep.mubr.bf16.mxu0 %v900_v12  ;;  %799 = vmatprep.mubr.bf16.mxu1 %v901_v13 }
  0x71   : > { %784 = vmatmul.mubr.bf16.gmra.mxu0 %v902_v14  ;;  %800 = vmatmul.mubr.bf16.gmra.mxu1 %v903_v15 }
  0x72   : > { %787 = vmatprep.mubr.bf16.mxu0 %v904_v16  ;;  %803 = vmatprep.mubr.bf16.mxu1 %v905_v17 }
  0x79   : > { %788 = vmatmul.mubr.bf16.gmra.mxu0 %v906_v18  ;;  %804 = vmatmul.mubr.bf16.gmra.mxu1 %v907_v19 }
  0x7a   : > { %791 = vmatprep.mubr.bf16.mxu0 %v908_v20  ;;  %807 = vmatprep.mubr.bf16.mxu1 %v909_v21 }
  0x81   : > { %792 = vmatmul.mubr.bf16.gmra.mxu0 %v910_v22  ;;  %808 = vmatmul.mubr.bf16.gmra.mxu1 %v911_v23 }
 0x129   : > { %v781_v25 = vpop.f32.mrf.mxu0  ;;  %v797_v26 = vpop.f32.mrf.mxu1 }
 0x12a   : > { %v449_v27 = vadd.f32 %v781_v25, %v1219_v24  ;;  %v513_v28 = vadd.f32 %v797_v26, %v1219_v24 }
 0x12b   : > { %v440_v29 = vpop.f32.mrf.mxu0  ;;  %v504_v30 = vpop.f32.mrf.mxu1 }
 0x12c   : > { %569 = vst [vmem:[%s1223_s29 + $0x10] sm:$0xff] %v449_v27  ;;  %585 = vst [vmem:[%s1223_s29 + $0x90] sm:$0xff] %v513_v28  ;;  %v441_v31 = vadd.f32 %v1219_v24, %v440_v29  ;;  %v505_v32 = vadd.f32 %v1219_v24, %v504_v30 }
 0x12d   : > { %v782_v33 = vpop.f32.mrf.mxu0  ;;  %v798_v34 = vpop.f32.mrf.mxu1 }
 0x12e   : > { %567 = vst [vmem:[%s1223_s29] sm:$0xff] %v441_v31  ;;  %583 = vst [vmem:[%s1223_s29 + $0x80] sm:$0xff] %v505_v32  ;;  %v452_v35 = vadd.f32 %v782_v33, %v1219_v24  ;;  %v516_v36 = vadd.f32 %v798_v34, %v1219_v24 }
 0x12f   : > { %v443_v37 = vpop.f32.mrf.mxu0  ;;  %v507_v38 = vpop.f32.mrf.mxu1 }
 0x130   : > { %570 = vst [vmem:[%s1223_s29 + $0x18] sm:$0xff] %v452_v35  ;;  %586 = vst [vmem:[%s1223_s29 + $0x98] sm:$0xff] %v516_v36  ;;  %v444_v39 = vadd.f32 %v1219_v24, %v443_v37  ;;  %v508_v40 = vadd.f32 %v1219_v24, %v507_v38 }
 0x131   : > { %v785_v41 = vpop.f32.mrf.mxu0  ;;  %v801_v42 = vpop.f32.mrf.mxu1 }
 0x132   : > { %568 = vst [vmem:[%s1223_s29 + $0x8] sm:$0xff] %v444_v39  ;;  %584 = vst [vmem:[%s1223_s29 + $0x88] sm:$0xff] %v508_v40  ;;  %v465_v43 = vadd.f32 %v785_v41, %v1219_v24  ;;  %v529_v44 = vadd.f32 %v801_v42, %v1219_v24 }
 0x133   : > { %v456_v45 = vpop.f32.mrf.mxu0  ;;  %v520_v46 = vpop.f32.mrf.mxu1 }
 0x134   : > { %573 = vst [vmem:[%s1223_s29 + $0x30] sm:$0xff] %v465_v43  ;;  %589 = vst [vmem:[%s1223_s29 + $0xb0] sm:$0xff] %v529_v44  ;;  %v457_v47 = vadd.f32 %v1219_v24, %v456_v45  ;;  %v521_v48 = vadd.f32 %v1219_v24, %v520_v46 }
 0x135   : > { %v786_v49 = vpop.f32.mrf.mxu0  ;;  %v802_v50 = vpop.f32.mrf.mxu1 }
 0x136   : > { %571 = vst [vmem:[%s1223_s29 + $0x20] sm:$0xff] %v457_v47  ;;  %587 = vst [vmem:[%s1223_s29 + $0xa0] sm:$0xff] %v521_v48  ;;  %v468_v51 = vadd.f32 %v786_v49, %v1219_v24  ;;  %v532_v52 = vadd.f32 %v802_v50, %v1219_v24 }
 0x137   : > { %v459_v53 = vpop.f32.mrf.mxu0  ;;  %v523_v54 = vpop.f32.mrf.mxu1 }
 0x138   : > { %574 = vst [vmem:[%s1223_s29 + $0x38] sm:$0xff] %v468_v51  ;;  %590 = vst [vmem:[%s1223_s29 + $0xb8] sm:$0xff] %v532_v52  ;;  %v460_v55 = vadd.f32 %v1219_v24, %v459_v53  ;;  %v524_v56 = vadd.f32 %v1219_v24, %v523_v54 }
 0x139   : > { %v789_v57 = vpop.f32.mrf.mxu0  ;;  %v805_v58 = vpop.f32.mrf.mxu1 }
 0x13a   : > { %572 = vst [vmem:[%s1223_s29 + $0x28] sm:$0xff] %v460_v55  ;;  %588 = vst [vmem:[%s1223_s29 + $0xa8] sm:$0xff] %v524_v56  ;;  %v481_v59 = vadd.f32 %v789_v57, %v1219_v24  ;;  %v545_v60 = vadd.f32 %v805_v58, %v1219_v24 }
 0x13b   : > { %v472_v61 = vpop.f32.mrf.mxu0  ;;  %v536_v62 = vpop.f32.mrf.mxu1 }
 0x13c   : > { %577 = vst [vmem:[%s1223_s29 + $0x50] sm:$0xff] %v481_v59  ;;  %593 = vst [vmem:[%s1223_s29 + $0xd0] sm:$0xff] %v545_v60  ;;  %v473_v63 = vadd.f32 %v1219_v24, %v472_v61  ;;  %v537_v0 = vadd.f32 %v1219_v24, %v536_v62 }
 0x13d   : > { %v790_v1 = vpop.f32.mrf.mxu0  ;;  %v806_v2 = vpop.f32.mrf.mxu1 }
 0x13e   : > { %575 = vst [vmem:[%s1223_s29 + $0x40] sm:$0xff] %v473_v63  ;;  %591 = vst [vmem:[%s1223_s29 + $0xc0] sm:$0xff] %v537_v0  ;;  %v484_v3 = vadd.f32 %v790_v1, %v1219_v24  ;;  %v548_v4 = vadd.f32 %v806_v2, %v1219_v24 }
 0x13f   : > { %v475_v5 = vpop.f32.mrf.mxu0  ;;  %v539_v6 = vpop.f32.mrf.mxu1 }
 0x140   : > { %578 = vst [vmem:[%s1223_s29 + $0x58] sm:$0xff] %v484_v3  ;;  %594 = vst [vmem:[%s1223_s29 + $0xd8] sm:$0xff] %v548_v4  ;;  %v476_v7 = vadd.f32 %v1219_v24, %v475_v5  ;;  %v540_v8 = vadd.f32 %v1219_v24, %v539_v6 }
 0x141   : > { %v793_v9 = vpop.f32.mrf.mxu0  ;;  %v809_v10 = vpop.f32.mrf.mxu1 }
 0x142   : > { %576 = vst [vmem:[%s1223_s29 + $0x48] sm:$0xff] %v476_v7  ;;  %592 = vst [vmem:[%s1223_s29 + $0xc8] sm:$0xff] %v540_v8  ;;  %v497_v11 = vadd.f32 %v793_v9, %v1219_v24  ;;  %v561_v12 = vadd.f32 %v809_v10, %v1219_v24 }
 0x143   : > { %v488_v13 = vpop.f32.mrf.mxu0  ;;  %v552_v14 = vpop.f32.mrf.mxu1 }
 0x144   : > { %581 = vst [vmem:[%s1223_s29 + $0x70] sm:$0xff] %v497_v11  ;;  %597 = vst [vmem:[%s1223_s29 + $0xf0] sm:$0xff] %v561_v12  ;;  %v489_v15 = vadd.f32 %v1219_v24, %v488_v13  ;;  %v553_v16 = vadd.f32 %v1219_v24, %v552_v14 }
 0x145   : > { %v794_v17 = vpop.f32.mrf.mxu0  ;;  %v810_v18 = vpop.f32.mrf.mxu1 }
 0x146   : > { %579 = vst [vmem:[%s1223_s29 + $0x60] sm:$0xff] %v489_v15  ;;  %595 = vst [vmem:[%s1223_s29 + $0xe0] sm:$0xff] %v553_v16  ;;  %v500_v19 = vadd.f32 %v794_v17, %v1219_v24  ;;  %v564_v20 = vadd.f32 %v810_v18, %v1219_v24 }
 0x147   : > { %v491_v21 = vpop.f32.mrf.mxu0  ;;  %v555_v22 = vpop.f32.mrf.mxu1 }
 0x148   : > { %582 = vst [vmem:[%s1223_s29 + $0x78] sm:$0xff] %v500_v19  ;;  %598 = vst [vmem:[%s1223_s29 + $0xf8] sm:$0xff] %v564_v20  ;;  %v492_v23 = vadd.f32 %v1219_v24, %v491_v21  ;;  %v556_v25 = vadd.f32 %v1219_v24, %v555_v22 }
 0x14a   : > { %580 = vst [vmem:[%s1223_s29 + $0x68] sm:$0xff] %v492_v23  ;;  %596 = vst [vmem:[%s1223_s29 + $0xe8] sm:$0xff] %v556_v25 }
 0x14b   : > { %979 = shalt.err (!%p976_p0)
}
 0x14c   : > { %s980_s21 = scalar_lea.hbm %s1286_s8, 4096  ;;  %s984_s4 = scalar_lea.hbm %s1340_s3, 8192 }
 0x14d   : > { %p981_p5 = scmp.ne.s32.totalorder %s1286_s8, %s980_s21  ;;  %p985_p4 = scmp.lt.s32.totalorder %s1286_s8, %s1340_s3 }
 0x14e   : > { %p986_p6 = scmp.lt.s32.totalorder %s984_s4, %s980_s21 }
 0x14f   : > { %p982_p2 = pnand %p981_p5, %p1356_p11 }
 0x150   : > { %p987_p8 = por %p986_p6, %p985_p4 }
 0x151   : > { %p983_p1 = pneg %p982_p2 }
 0x153   : > { %p988_p3 = pnand %p987_p8, %p983_p1 }
 0x155   : > { %991 = shalt.err (!%p988_p3)
}
 0x156   : > { %s1041_s28 = smov 128   ;;  %s1042_s29 = smov 8  }
 0x157   : > { %833 = dma.vmem_to_hbm [thread:$0]  (%p1356_p11), %s1288_s22, 4096, %s1286_s8, %s600_s16, %s1041_s28, %s1041_s28, %s1042_s29  }
 0x158 PF: > { %s628_s17 = sand.u32 1, %s1022_s12   ;;  %p1357_p7 = scmp.ne.s32.totalorder %s1346_s19, 0 }
 0x159   : > { %p1358_p9 = scmp.ge.s32.totalorder %s1034_s15, 2  ;;  %s629_s23 = scalar_lea.sflag [#allocation4], %s628_s17 }
 0x15b   : > { %p844_p10 = pnand %p1358_p9, %p1357_p7 }
 0x15d   : > { %p845_p12 = pneg %p844_p10 }
 0x15f   : > { %1017 = dma.done.wait (%p845_p12), %s629_s23, 4096  }
 0x160   : > { %1019 = vsyncadd (%p845_p12), %s629_s23, 4294963200  ;;  %p17_p13 = scmp.ge.s32.totalorder %s1117_s24, 4   ;;  %s1359_s12 = smov %s1026_s13 }
 0x161   : > { %s1360_s13 = smov %s1030_s14  ;;  %s1361_s14 = smov %s1137_s5 }
 0x162   : > { %s1362_s15 = smov %s1117_s24  ;;  %19 = sbr.rel (!%p17_p13) target bundleno = 6 (0x6), region = 81 }
 0x167   :  { %634 = vsyncpa [#allocation3], 1 }
 0x168   :  { %636 = vsyncpa [#allocation3 + $0x1], 1 }
 0x169   :  { %637 = vsyncpa [#allocation6], 1 }
 0x16a   :  { %638 = vsyncpa [#allocation4], 1 }
 0x16b   :  { %640 = vsyncpa [#allocation4 + $0x1], 1 }

</bundles_post_ra>
